<compile_context>
chip_gen: v6e
topology: v6e:2x2x1
jax: 0.10.0
libtpu: 0.0.40
codegen_flags: <defaults>
</compile_context>

<pallas_src>
import jax
import jax.numpy as jnp
from jax.experimental import pallas as pl
from jax.experimental.pallas import tpu as pltpu

N, C_IN, H, W = 1, 2, 3, 3
C_OUT = 2
PAD = 1
HP, WP = H + 2 * PAD, W + 2 * PAD  # 5, 5  (conv output spatial dims, 1x1 kernel)


def _pad_hw(a):
    """Zero-pad an (H, W) tile to (HP, WP) purely in registers (vregs)."""
    zc = jnp.zeros((H, PAD), jnp.float32)
    zr = jnp.zeros((PAD, WP), jnp.float32)
    a = jnp.concatenate([zc, a, zc], axis=1)      # (H, WP)
    return jnp.concatenate([zr, a, zr], axis=0)   # (HP, WP)


def model_kernel(p_ref, x_ref, o_ref):
    """p_ref : SMEM (6,)  packed params [w00, w01, w10, w11, b0, b1]
       x_ref : VMEM (C_IN, H, W)   raw (unpadded) input
       o_ref : VMEM (C_OUT, HP, WP) final result t7
    """
    # Hoist the scalars out of SMEM once (keeps sld off the compute body).
    w00 = p_ref[0]
    w01 = p_ref[1]
    w10 = p_ref[2]
    w11 = p_ref[3]
    b0 = p_ref[4]
    b1 = p_ref[5]

    x0 = x_ref[0]  # (H, W)
    x1 = x_ref[1]  # (H, W)

    # Static unroll over the 2 output channels.
    for c, (wa, wb, b) in enumerate(((w00, w01, b0), (w10, w11, b1))):
        # 1x1 conv on the raw 3x3 interior; fold the Conv2d zero padding in
        # registers.  Border of the padded interior is 0, so border of t1 == b.
        t1 = _pad_hw(wa * x0 + wb * x1) + b        # (HP, WP)
        t3 = jnp.clip(t1 + 3.0, 0.0, 6.0)          # clamp(t1 + 3, 0, 6)
        t5 = t3 * t1
        # 5x5 contraction  t6[i,k] = sum_j t5[i,j] * t3[j,k]  as 5 rank-1
        # outer-product FMAs: stays in 2-D (sublane, lane) vregs.
        t6 = t5[:, 0:1] * t3[0:1, :]
        for j in range(1, WP):
            t6 = t6 + t5[:, j:j + 1] * t3[j:j + 1, :]
        o_ref[c] = t6 * (1.0 / 6.0)                # t7 = t6 / 6, per-channel store


def pack_params(weight, bias):
    """One-time packing of Conv2d(2,2,1) params into a single (6,) SMEM operand.

    weight: (C_OUT, C_IN) f32 (1x1 conv kernel squeezed), row-major (co, ci).
    Do this at parameter-prep time, NOT per forward call.
    """
    return jnp.concatenate([weight.reshape(-1), bias])


@jax.jit
def model_forward(x, params):
    """x: (N, C_IN, H, W) f32; params: (6,) f32 from pack_params."""
    x3 = x.reshape(C_IN, H, W)        # N == 1: drop the batch dim for the kernel
    out = pl.pallas_call(
        model_kernel,
        out_shape=jax.ShapeDtypeStruct((C_OUT, HP, WP), jnp.float32),
        in_specs=[
            pl.BlockSpec(memory_space=pltpu.MemorySpace.SMEM),   # packed params
            pl.BlockSpec(memory_space=pltpu.MemorySpace.VMEM),   # input
        ],
        out_specs=pl.BlockSpec(memory_space=pltpu.MemorySpace.VMEM),
        # Advisory: ~1 KFLOP / a few hundred bytes — don't schedule this as a
        # heavy custom call when embedded in a larger graph.
        cost_estimate=pl.CostEstimate(
            flops=2 * C_OUT * (C_IN * H * W + HP * WP * (WP + 3)),
            transcendentals=0,
            bytes_accessed=4 * (C_IN * H * W + C_OUT * C_IN + C_OUT
                                + C_OUT * HP * WP),
        ),
    )(params, x3)
    return out.reshape(N, C_OUT, HP, WP)


def reference_forward(x, weight, bias):
    """Pure-JAX reference for correctness check."""
    x_pad = jnp.pad(x, ((0, 0), (0, 0), (PAD, PAD), (PAD, PAD)))
    t1 = jnp.einsum("oc,nchw->nohw", weight, x_pad) + bias.reshape(1, C_OUT, 1, 1)
    t3 = jnp.clip(t1 + 3.0, 0.0, 6.0)
    t5 = t3 * t1
    t6 = jnp.einsum("ncij,ncjk->ncik", t5, t3)
    return t6 / 6.0


if __name__ == "__main__":
    key = jax.random.PRNGKey(0)
    kx, kw, kb = jax.random.split(key, 3)

    # Deterministic parameter init (Conv2d(2,2,1) -> weight (2,2,1,1) squeezed, bias (2,))
    x = jax.random.normal(kx, (N, C_IN, H, W), dtype=jnp.float32)
    weight = jax.random.normal(kw, (C_OUT, C_IN), dtype=jnp.float32) * 0.5
    bias = jax.random.normal(kb, (C_OUT,), dtype=jnp.float32) * 0.1

    params = pack_params(weight, bias)   # one-time packing, outside the call path

    out = jax.block_until_ready(model_forward(x, params))

    ref = reference_forward(x, weight, bias)
    assert out.shape == (N, C_OUT, HP, WP)
    assert jnp.allclose(out, ref, atol=1e-4, rtol=1e-4), "mismatch vs reference"

    print("KERNEL_OK")
</pallas_src>

<mosaic_0001>
module attributes {stable_mosaic.version = 11 : i64} {
  func.func @model_kernel(%arg0: memref<6xf32, #tpu.memory_space<smem>>, %arg1: memref<2x3x3xf32, #tpu.memory_space<vmem>>, %arg2: memref<2x5x5xf32, #tpu.memory_space<vmem>>) attributes {dimension_semantics = [], scalar_prefetch = 0 : i64, scratch_operands = 0 : i64, tpu.core_type = #tpu.core_type<tc>} {
    %c0 = arith.constant 0 : index
    %0 = memref.load %arg0[%c0] : memref<6xf32, #tpu.memory_space<smem>>
    %c1 = arith.constant 1 : index
    %1 = memref.load %arg0[%c1] : memref<6xf32, #tpu.memory_space<smem>>
    %c2 = arith.constant 2 : index
    %2 = memref.load %arg0[%c2] : memref<6xf32, #tpu.memory_space<smem>>
    %c3 = arith.constant 3 : index
    %3 = memref.load %arg0[%c3] : memref<6xf32, #tpu.memory_space<smem>>
    %c4 = arith.constant 4 : index
    %4 = memref.load %arg0[%c4] : memref<6xf32, #tpu.memory_space<smem>>
    %c5 = arith.constant 5 : index
    %5 = memref.load %arg0[%c5] : memref<6xf32, #tpu.memory_space<smem>>
    %c0_0 = arith.constant 0 : index
    %c0_1 = arith.constant 0 : index
    %c0_2 = arith.constant 0 : index
    %6 = vector.load %arg1[%c0_0, %c0_1, %c0_2] : memref<2x3x3xf32, #tpu.memory_space<vmem>>, vector<1x3x3xf32>
    %7 = vector.shape_cast %6 : vector<1x3x3xf32> to vector<3x3xf32>
    %c1_3 = arith.constant 1 : index
    %c0_4 = arith.constant 0 : index
    %c0_5 = arith.constant 0 : index
    %8 = vector.load %arg1[%c1_3, %c0_4, %c0_5] : memref<2x3x3xf32, #tpu.memory_space<vmem>>, vector<1x3x3xf32>
    %9 = vector.shape_cast %8 : vector<1x3x3xf32> to vector<3x3xf32>
    %10 = vector.broadcast %0 : f32 to vector<3x3xf32>
    %11 = arith.mulf %10, %7 : vector<3x3xf32>
    %12 = vector.broadcast %1 : f32 to vector<3x3xf32>
    %13 = arith.mulf %12, %9 : vector<3x3xf32>
    %14 = arith.addf %11, %13 : vector<3x3xf32>
    %cst = arith.constant 0.000000e+00 : f32
    %15 = vector.broadcast %cst : f32 to vector<3x1xf32>
    %cst_6 = arith.constant 0.000000e+00 : f32
    %16 = vector.broadcast %cst_6 : f32 to vector<1x5xf32>
    %17 = tpu.concatenate %15, %14, %15 in 1 : vector<3x1xf32>, vector<3x3xf32>, vector<3x1xf32> -> vector<3x5xf32>
    %18 = tpu.concatenate %16, %17, %16 in 0 : vector<1x5xf32>, vector<3x5xf32>, vector<1x5xf32> -> vector<5x5xf32>
    %19 = vector.broadcast %4 : f32 to vector<5x5xf32>
    %20 = arith.addf %18, %19 : vector<5x5xf32>
    %cst_7 = arith.constant 3.000000e+00 : f32
    %21 = vector.broadcast %cst_7 : f32 to vector<5x5xf32>
    %22 = arith.addf %20, %21 : vector<5x5xf32>
    %cst_8 = arith.constant 0.000000e+00 : f32
    %cst_9 = arith.constant 6.000000e+00 : f32
    %23 = vector.broadcast %cst_8 : f32 to vector<5x5xf32>
    %24 = arith.maximumf %23, %22 : vector<5x5xf32>
    %25 = vector.broadcast %cst_9 : f32 to vector<5x5xf32>
    %26 = arith.minimumf %25, %24 : vector<5x5xf32>
    %27 = arith.mulf %26, %20 : vector<5x5xf32>
    %28 = vector.extract_strided_slice %27 {offsets = [0, 0], sizes = [5, 1], strides = [1, 1]} : vector<5x5xf32> to vector<5x1xf32>
    %29 = vector.extract_strided_slice %26 {offsets = [0, 0], sizes = [1, 5], strides = [1, 1]} : vector<5x5xf32> to vector<1x5xf32>
    %30 = vector.broadcast %28 : vector<5x1xf32> to vector<5x5xf32>
    %31 = vector.broadcast %29 : vector<1x5xf32> to vector<5x5xf32>
    %32 = arith.mulf %30, %31 : vector<5x5xf32>
    %33 = vector.extract_strided_slice %27 {offsets = [0, 1], sizes = [5, 1], strides = [1, 1]} : vector<5x5xf32> to vector<5x1xf32>
    %34 = vector.extract_strided_slice %26 {offsets = [1, 0], sizes = [1, 5], strides = [1, 1]} : vector<5x5xf32> to vector<1x5xf32>
    %35 = vector.broadcast %33 : vector<5x1xf32> to vector<5x5xf32>
    %36 = vector.broadcast %34 : vector<1x5xf32> to vector<5x5xf32>
    %37 = arith.mulf %35, %36 : vector<5x5xf32>
    %38 = arith.addf %32, %37 : vector<5x5xf32>
    %39 = vector.extract_strided_slice %27 {offsets = [0, 2], sizes = [5, 1], strides = [1, 1]} : vector<5x5xf32> to vector<5x1xf32>
    %40 = vector.extract_strided_slice %26 {offsets = [2, 0], sizes = [1, 5], strides = [1, 1]} : vector<5x5xf32> to vector<1x5xf32>
    %41 = vector.broadcast %39 : vector<5x1xf32> to vector<5x5xf32>
    %42 = vector.broadcast %40 : vector<1x5xf32> to vector<5x5xf32>
    %43 = arith.mulf %41, %42 : vector<5x5xf32>
    %44 = arith.addf %38, %43 : vector<5x5xf32>
    %45 = vector.extract_strided_slice %27 {offsets = [0, 3], sizes = [5, 1], strides = [1, 1]} : vector<5x5xf32> to vector<5x1xf32>
    %46 = vector.extract_strided_slice %26 {offsets = [3, 0], sizes = [1, 5], strides = [1, 1]} : vector<5x5xf32> to vector<1x5xf32>
    %47 = vector.broadcast %45 : vector<5x1xf32> to vector<5x5xf32>
    %48 = vector.broadcast %46 : vector<1x5xf32> to vector<5x5xf32>
    %49 = arith.mulf %47, %48 : vector<5x5xf32>
    %50 = arith.addf %44, %49 : vector<5x5xf32>
    %51 = vector.extract_strided_slice %27 {offsets = [0, 4], sizes = [5, 1], strides = [1, 1]} : vector<5x5xf32> to vector<5x1xf32>
    %52 = vector.extract_strided_slice %26 {offsets = [4, 0], sizes = [1, 5], strides = [1, 1]} : vector<5x5xf32> to vector<1x5xf32>
    %53 = vector.broadcast %51 : vector<5x1xf32> to vector<5x5xf32>
    %54 = vector.broadcast %52 : vector<1x5xf32> to vector<5x5xf32>
    %55 = arith.mulf %53, %54 : vector<5x5xf32>
    %56 = arith.addf %50, %55 : vector<5x5xf32>
    %cst_10 = arith.constant 0.166666672 : f32
    %57 = vector.broadcast %cst_10 : f32 to vector<5x5xf32>
    %58 = arith.mulf %56, %57 : vector<5x5xf32>
    %c0_11 = arith.constant 0 : index
    %c0_12 = arith.constant 0 : index
    %c0_13 = arith.constant 0 : index
    %59 = vector.load %arg2[%c0_11, %c0_12, %c0_13] : memref<2x5x5xf32, #tpu.memory_space<vmem>>, vector<1x5x5xf32>
    %60 = vector.shape_cast %59 : vector<1x5x5xf32> to vector<5x5xf32>
    %61 = vector.shape_cast %58 : vector<5x5xf32> to vector<1x5x5xf32>
    tpu.vector_store %arg2[%c0_11, %c0_12, %c0_13], %61 {strides = array<i32>} : memref<2x5x5xf32, #tpu.memory_space<vmem>>, vector<1x5x5xf32>,
    %62 = vector.broadcast %2 : f32 to vector<3x3xf32>
    %63 = arith.mulf %62, %7 : vector<3x3xf32>
    %64 = vector.broadcast %3 : f32 to vector<3x3xf32>
    %65 = arith.mulf %64, %9 : vector<3x3xf32>
    %66 = arith.addf %63, %65 : vector<3x3xf32>
    %cst_14 = arith.constant 0.000000e+00 : f32
    %67 = vector.broadcast %cst_14 : f32 to vector<3x1xf32>
    %cst_15 = arith.constant 0.000000e+00 : f32
    %68 = vector.broadcast %cst_15 : f32 to vector<1x5xf32>
    %69 = tpu.concatenate %67, %66, %67 in 1 : vector<3x1xf32>, vector<3x3xf32>, vector<3x1xf32> -> vector<3x5xf32>
    %70 = tpu.concatenate %68, %69, %68 in 0 : vector<1x5xf32>, vector<3x5xf32>, vector<1x5xf32> -> vector<5x5xf32>
    %71 = vector.broadcast %5 : f32 to vector<5x5xf32>
    %72 = arith.addf %70, %71 : vector<5x5xf32>
    %cst_16 = arith.constant 3.000000e+00 : f32
    %73 = vector.broadcast %cst_16 : f32 to vector<5x5xf32>
    %74 = arith.addf %72, %73 : vector<5x5xf32>
    %cst_17 = arith.constant 0.000000e+00 : f32
    %cst_18 = arith.constant 6.000000e+00 : f32
    %75 = vector.broadcast %cst_17 : f32 to vector<5x5xf32>
    %76 = arith.maximumf %75, %74 : vector<5x5xf32>
    %77 = vector.broadcast %cst_18 : f32 to vector<5x5xf32>
    %78 = arith.minimumf %77, %76 : vector<5x5xf32>
    %79 = arith.mulf %78, %72 : vector<5x5xf32>
    %80 = vector.extract_strided_slice %79 {offsets = [0, 0], sizes = [5, 1], strides = [1, 1]} : vector<5x5xf32> to vector<5x1xf32>
    %81 = vector.extract_strided_slice %78 {offsets = [0, 0], sizes = [1, 5], strides = [1, 1]} : vector<5x5xf32> to vector<1x5xf32>
    %82 = vector.broadcast %80 : vector<5x1xf32> to vector<5x5xf32>
    %83 = vector.broadcast %81 : vector<1x5xf32> to vector<5x5xf32>
    %84 = arith.mulf %82, %83 : vector<5x5xf32>
    %85 = vector.extract_strided_slice %79 {offsets = [0, 1], sizes = [5, 1], strides = [1, 1]} : vector<5x5xf32> to vector<5x1xf32>
    %86 = vector.extract_strided_slice %78 {offsets = [1, 0], sizes = [1, 5], strides = [1, 1]} : vector<5x5xf32> to vector<1x5xf32>
    %87 = vector.broadcast %85 : vector<5x1xf32> to vector<5x5xf32>
    %88 = vector.broadcast %86 : vector<1x5xf32> to vector<5x5xf32>
    %89 = arith.mulf %87, %88 : vector<5x5xf32>
    %90 = arith.addf %84, %89 : vector<5x5xf32>
    %91 = vector.extract_strided_slice %79 {offsets = [0, 2], sizes = [5, 1], strides = [1, 1]} : vector<5x5xf32> to vector<5x1xf32>
    %92 = vector.extract_strided_slice %78 {offsets = [2, 0], sizes = [1, 5], strides = [1, 1]} : vector<5x5xf32> to vector<1x5xf32>
    %93 = vector.broadcast %91 : vector<5x1xf32> to vector<5x5xf32>
    %94 = vector.broadcast %92 : vector<1x5xf32> to vector<5x5xf32>
    %95 = arith.mulf %93, %94 : vector<5x5xf32>
    %96 = arith.addf %90, %95 : vector<5x5xf32>
    %97 = vector.extract_strided_slice %79 {offsets = [0, 3], sizes = [5, 1], strides = [1, 1]} : vector<5x5xf32> to vector<5x1xf32>
    %98 = vector.extract_strided_slice %78 {offsets = [3, 0], sizes = [1, 5], strides = [1, 1]} : vector<5x5xf32> to vector<1x5xf32>
    %99 = vector.broadcast %97 : vector<5x1xf32> to vector<5x5xf32>
    %100 = vector.broadcast %98 : vector<1x5xf32> to vector<5x5xf32>
    %101 = arith.mulf %99, %100 : vector<5x5xf32>
    %102 = arith.addf %96, %101 : vector<5x5xf32>
    %103 = vector.extract_strided_slice %79 {offsets = [0, 4], sizes = [5, 1], strides = [1, 1]} : vector<5x5xf32> to vector<5x1xf32>
    %104 = vector.extract_strided_slice %78 {offsets = [4, 0], sizes = [1, 5], strides = [1, 1]} : vector<5x5xf32> to vector<1x5xf32>
    %105 = vector.broadcast %103 : vector<5x1xf32> to vector<5x5xf32>
    %106 = vector.broadcast %104 : vector<1x5xf32> to vector<5x5xf32>
    %107 = arith.mulf %105, %106 : vector<5x5xf32>
    %108 = arith.addf %102, %107 : vector<5x5xf32>
    %cst_19 = arith.constant 0.166666672 : f32
    %109 = vector.broadcast %cst_19 : f32 to vector<5x5xf32>
    %110 = arith.mulf %108, %109 : vector<5x5xf32>
    %c1_20 = arith.constant 1 : index
    %c0_21 = arith.constant 0 : index
    %c0_22 = arith.constant 0 : index
    %111 = vector.load %arg2[%c1_20, %c0_21, %c0_22] : memref<2x5x5xf32, #tpu.memory_space<vmem>>, vector<1x5x5xf32>
    %112 = vector.shape_cast %111 : vector<1x5x5xf32> to vector<5x5xf32>
    %113 = vector.shape_cast %110 : vector<5x5xf32> to vector<1x5x5xf32>
    tpu.vector_store %arg2[%c1_20, %c0_21, %c0_22], %113 {strides = array<i32>} : memref<2x5x5xf32, #tpu.memory_space<vmem>>, vector<1x5x5xf32>,
    return
  }
}

</mosaic_0001>

<bundles_post_ra>
// kernel: model_forward.1
= control target key start
LH: loop header
LB: loop body
LE: loop exit
PB: predicated region body
PF: predicated region fallthrough
CT: control target
= control target key end

     0   :  { %7 = vsyncpa [#allocation3], 0  ;;  %s273_s0 = inlined_call_operand.vmem [shape: f32[6], index: 0, kind: input, shape index: {}]   ;;  %s274_s1 = inlined_call_operand.vmem [shape: f32[2,3,3], index: 1, kind: input, shape index: {}]   ;;  %s275_s2 = inlined_call_operand.vmem [shape: f32[2,5,5], index: 2, kind: output, shape index: {}]  }
   0x1   :  { %s14_s11 = sshll.u32 %s273_s0, 4  ;;  %s15_s11 = int_to_ptr.vmem [resolvable:$true] %s14_s11 }
   0x2   :  { %s214_s12 = scalar_lea.vmem %s15_s11, 16  ;;  %p219_p1 = scmp.lt.s32.totalorder %s15_s11, %s15_s11 }
   0x3   :  { %p215_p0 = scmp.ne.s32.totalorder %s15_s11, %s214_s12  ;;  %p220_p2 = scmp.lt.s32.totalorder %s214_s12, %s214_s12 }
   0x5   :  { %p221_p3 = por %p220_p2, %p219_p1 }
   0x7   :  { %p222_p4 = pnand %p221_p3, %p215_p0 }
   0x9   :  { %225 = shalt.err (!%p222_p4)
}
   0xa   :  { %s228_s13 = smov [#allocation2]  }
   0xb   :  { %17 = dma.vmem_to_smem %s15_s11, 16, %s228_s13, [#allocation3]  }
   0xc   :  { %226 = dma.done.wait [#allocation3], 16  }
   0xd   :  { %227 = vsyncadd [#allocation3], 4294967280 }
   0xe   :  { %23 = sfence }
   0xf   :  { %s24_s14 = sld [smem:[#allocation2]]  ;;  %v30_v0 = vld [vmem:[%s274_s1] sm:$0x7]  ;;  %v197_v1 = vld [vmem:[%s274_s1 + $0x4] sm:$0x7]  ;;  %s229_s21 = smov 1   ;;  %v64_v41 = vlaneseq }
  0x10   :  { %s192_s15 = sld [smem:[#allocation2 + $0x1]]  ;;  %v230_v12 = vmov 0   ;;  %vm42_vm0 = vcmask 7168   ;;  %vm44_vm1 = vcmask 31744   ;;  %vm49_vm2 = vcmask 1040384  }
  0x11   :  { %s193_s16 = sld [smem:[#allocation2 + $0x2]]  ;;  %206 = vset.pattern.permute.xlu1 %v230_v12  ;;  %208 = vset.pattern.permute.xlu0 %v230_v12  ;;  %vm51_vm3 = vcmask 1043456   ;;  %v231_v37 = vmov 1   ;;  %v232_v38 = vmov 2   ;;  %v233_v39 = vmov 4  }
  0x12   :  { %s194_s17 = sld [smem:[#allocation2 + $0x3]]  ;;  %v234_v40 = vmov 3   ;;  %v65_v43 = vshrl.u32 %v64_v41, 7  ;;  %vm110_vm4 = vcmask 36864  }
  0x13   :  { %s195_s22 = sld [smem:[#allocation2 + $0x4]] }
  0x14   :  { %s196_s1 = sld [smem:[#allocation2 + $0x5]]  ;;  %v75_v46 = vsub.s32 1, %v65_v43  ;;  %v66_v48 = vsub.s32 0, %v65_v43  ;;  %v85_v49 = vsub.s32 2, %v65_v43  ;;  %v95_v56 = vsub.s32 3, %v65_v43 }
  0x15   :  { %v33_v2 = vstv %s24_s14  ;;  %v105_v59 = vsub.s32 4, %v65_v43 }
  0x16   :  { %v34_v3 = vmul.f32 %v33_v2, %v30_v0  ;;  %v35_v4 = vstv %s192_s15 }
  0x17   :  { %v36_v5 = vmul.f32 %v197_v1, %v35_v4  ;;  %v112_v6 = vstv %s193_s16 }
  0x18   :  { %v113_v7 = vmul.f32 %v112_v6, %v30_v0  ;;  %v114_v8 = vstv %s194_s17 }
  0x19   :  { %v37_v9 = vadd.f32 %v36_v5, %v34_v3  ;;  %v115_v10 = vmul.f32 %v197_v1, %v114_v8  ;;  %v53_v17 = vstv %s195_s22 }
  0x1a   :  { %v128_v25 = vstv %s196_s1 }
  0x1b   :  { %39 = vrot.lane.b32.xlu0 %v37_v9, %s229_s21  ;;  %v116_v11 = vadd.f32 %v115_v10, %v113_v7 }
  0x1f   :  { %118 = vrot.lane.b32.xlu0 %v116_v11, %s229_s21 }
  0x8d   :  { %v40_v13 = vpop.permute.xlu0 %39 }
  0x8e   :  { %v43_v14 = vsel %vm42_vm0, 0.0, %v40_v13 }
  0x8f   :  { %v45_v15 = vsel %vm44_vm1, %v43_v14, 0.0 }
  0x90   :  { %v47_v16 = vrot.slane %v45_v15, 7 }
  0x91   :  { %v119_v18 = vpop.permute.xlu0 %118 }
  0x92   :  { %v50_v19 = vsel %vm49_vm2, 0.0, %v47_v16  ;;  %v121_v20 = vsel %vm42_vm0, 0.0, %v119_v18 }
  0x93   :  { %v52_v21 = vsel %vm51_vm3, %v50_v19, 0.0  ;;  %v122_v22 = vsel %vm44_vm1, %v121_v20, 0.0 }
  0x94   :  { %v54_v23 = vadd.f32 %v53_v17, %v52_v21  ;;  %v124_v24 = vrot.slane %v122_v22, 7 }
  0x96   :  { %v55_v26 = vadd.f32 3.0, %v54_v23  ;;  %v126_v27 = vsel %vm49_vm2, 0.0, %v124_v24 }
  0x97   :  { %v127_v28 = vsel %vm51_vm3, %v126_v27, 0.0 }
  0x98   :  { %v56_v29 = vmax.f32 %v55_v26, 0.0  ;;  %v129_v30 = vadd.f32 %v128_v25, %v127_v28 }
  0x9a   :  { %v57_v31 = vmin.f32 %v56_v29, 6.0  ;;  %v130_v32 = vadd.f32 3.0, %v129_v30 }
  0x9c   :  { %v58_v33 = vmul.f32 %v57_v31, %v54_v23  ;;  %v131_v34 = vmax.f32 %v130_v32, 0.0  ;;  %v76_v50 = vrot.slane %v57_v31, %v75_v46  ;;  %v67_v52 = vrot.slane %v57_v31, %v66_v48 }
  0x9d   :  { %v86_v54 = vrot.slane %v57_v31, %v85_v49  ;;  %v96_v62 = vrot.slane %v57_v31, %v95_v56  ;;  %v106_v4 = vrot.slane %v57_v31, %v105_v59 }
  0x9e   :  { %v259_v35 = vmin.f32 %v131_v34, 6.0  ;;  %61 = vperm.xlu1 %206, %v58_v33  }
  0xa0   :  { %v133_v36 = vmul.f32 %v259_v35, %v129_v30  ;;  %v151_v60 = vrot.slane %v259_v35, %v75_v46  ;;  %v142_v63 = vrot.slane %v259_v35, %v66_v48  ;;  %v161_v10 = vrot.slane %v259_v35, %v85_v49 }
  0xa1   :  { %v171_v11 = vrot.slane %v259_v35, %v95_v56  ;;  %v181_v18 = vrot.slane %v259_v35, %v105_v59 }
  0xa2   :  { %207 = vset.pattern.permute.xlu1 %v231_v37  ;;  %136 = vperm.xlu0 %208, %v133_v36  }
  0xa3   :  { %70 = vperm.xlu1 %207, %v58_v33  }
  0xa6   :  { %210 = vset.pattern.permute.xlu0 %v232_v38 }
  0xa7   :  { %145 = vperm.xlu1 %207, %v133_v36   ;;  %155 = vperm.xlu0 %210, %v133_v36  }
  0xab   :  { %209 = vset.pattern.permute.xlu1 %v232_v38  ;;  %212 = vset.pattern.permute.xlu0 %v233_v39 }
  0xac   :  { %80 = vperm.xlu1 %209, %v58_v33   ;;  %100 = vperm.xlu0 %212, %v58_v33  }
  0xb0   :  { %211 = vset.pattern.permute.xlu1 %v234_v40 }
  0xb1   :  { %90 = vperm.xlu1 %211, %v58_v33  }
  0xb5   :  { %165 = vperm.xlu1 %211, %v133_v36  }
  0xb9   :  { %213 = vset.pattern.permute.xlu1 %v233_v39 }
  0xba   :  { %175 = vperm.xlu1 %213, %v133_v36  }
 0x119   :  { %v62_v42 = vpop.permute.xlu1 %61 }
 0x11a   :  { %v68_v57 = vmul.f32 %v67_v52, %v62_v42 }
 0x11d   :  { %v137_v45 = vpop.permute.xlu0 %136 }
 0x11e   :  { %v71_v44 = vpop.permute.xlu1 %70  ;;  %v143_v6 = vmul.f32 %v142_v63, %v137_v45 }
 0x11f   :  { %v77_v53 = vmul.f32 %v76_v50, %v71_v44 }
 0x121   :  { %v78_v61 = vadd.f32 %v77_v53, %v68_v57 }
 0x122   :  { %v146_v47 = vpop.permute.xlu1 %145  ;;  %v156_v51 = vpop.permute.xlu0 %155 }
 0x123   :  { %v152_v0 = vmul.f32 %v151_v60, %v146_v47  ;;  %v162_v14 = vmul.f32 %v161_v10, %v156_v51 }
 0x125   :  { %v153_v9 = vadd.f32 %v152_v0, %v143_v6 }
 0x127   :  { %v81_v55 = vpop.permute.xlu1 %80  ;;  %v101_v1 = vpop.permute.xlu0 %100  ;;  %v163_v17 = vadd.f32 %v162_v14, %v153_v9 }
 0x128   :  { %v87_v58 = vmul.f32 %v86_v54, %v81_v55  ;;  %v107_v7 = vmul.f32 %v106_v4, %v101_v1 }
 0x12a   :  { %v88_v3 = vadd.f32 %v87_v58, %v78_v61 }
 0x12c   :  { %v91_v2 = vpop.permute.xlu1 %90 }
 0x12d   :  { %v97_v5 = vmul.f32 %v96_v62, %v91_v2 }
 0x12f   :  { %v98_v8 = vadd.f32 %v97_v5, %v88_v3 }
 0x130   :  { %v166_v12 = vpop.permute.xlu1 %165 }
 0x131   :  { %v108_v13 = vadd.f32 %v107_v7, %v98_v8  ;;  %v172_v15 = vmul.f32 %v171_v11, %v166_v12 }
 0x133   :  { %v109_v16 = vmul.f32 0.16666667, %v108_v13  ;;  %v173_v20 = vadd.f32 %v172_v15, %v163_v17 }
 0x135   :  { %v176_v19 = vpop.permute.xlu1 %175  ;;  %111 = vst.msk [vmem:[%s275_s2] sm:$0x1f] %vm110_vm4, %v109_v16 }
 0x136   :  { %v182_v21 = vmul.f32 %v181_v18, %v176_v19 }
 0x138   :  { %v183_v22 = vadd.f32 %v182_v21, %v173_v20 }
 0x13a   :  { %v184_v23 = vmul.f32 0.16666667, %v183_v22 }
 0x13c   :  { %198 = vst.msk [vmem:[%s275_s2 + $0x8] sm:$0x1f] %vm110_vm4, %v184_v23 }
 0x13d   :  { %191 = vsyncpa [#allocation3], 1 }

</bundles_post_ra>
